<compile_context>
chip_gen: v5e
topology: v5e:2x2
jax: 0.10.0
libtpu: 0.0.40
codegen_flags: <defaults>
</compile_context>

<pallas_src>
import numpy as np
import jax
import jax.numpy as jnp
from jax.experimental import pallas as pl
from jax.experimental.pallas import tpu as pltpu

ATOM_FDIM = 16
BOND_FDIM = 32
HIDDEN = 32
DEPTH = 3


def _round_up(x, m):
    return ((x + m - 1) // m) * m


def mpn_kernel(f_bonds_ref, f_atoms_ref, w_bonds_ref,
               wi_ref, wh_ref, wo_a_ref, wo_m_ref, bo_ref,
               a2b_ref, b2a_ref, r_ref, atom_scale_ref, out_ref):
    f32 = jnp.float32
    # 0/1 incidence matrices arrive as bf16 (exact for 0/1); upcast once, keep math f32.
    a2b = a2b_ref[...].astype(f32)          # (NAp, NBr)  atom <- incoming bonds
    b2a = b2a_ref[...].astype(f32)          # (NBr, NAp)  bond <- source atom
    r01 = r_ref[...].astype(f32)            # (NMp, NAp)  molecule <- member atoms
    w_b = w_bonds_ref[...]                  # (NBr, 1)    per-bond weight, f32

    # input = W_i(f_bonds); message = ReLU(input)
    inp = jnp.dot(f_bonds_ref[...], wi_ref[...], preferred_element_type=f32)
    message = jnp.maximum(inp, 0.0)

    half = message.shape[0] // 2            # reverse bond sits exactly `half` rows away

    for _ in range(DEPTH - 1):              # depth-1 message passing steps
        # a_message[a] = sum_{b into a} w_bonds[b] * message[b]
        #   = A2B(0/1) @ (message * w_bonds)   (weighting on VPU, matmul on MXU)
        msg_w = message * w_b
        a_msg = jnp.dot(a2b, msg_w, preferred_element_type=f32)          # (NAp, H)
        # rev_message = message[b2revb]: the pair partner lives `half` rows away, so
        # the gather is a static, 8-aligned half-rotation (no NBxNB permutation matmul).
        rev = jnp.concatenate([message[half:], message[:half]], axis=0)  # (NBr, H)
        # message_b = a_message[b2a[b]] - rev_message[b] * w_bonds[b]
        msg = jnp.dot(b2a, a_msg, preferred_element_type=f32) - rev * w_b
        # message = ReLU(input + W_h(message)); dropout p=0 -> identity
        msg = jnp.dot(msg, wh_ref[...], preferred_element_type=f32)
        message = jnp.maximum(inp + msg, 0.0)

    # final neighbourhood aggregation (same 0/1 A2B, same VPU weighting)
    a_msg = jnp.dot(a2b, message * w_b, preferred_element_type=f32)      # (NAp, H)
    # atom_hiddens = ReLU(W_o([f_atoms, a_message]) + b_o)
    # (concat split into two matmuls -- mathematically identical to one K=48 matmul)
    atom_h = jnp.maximum(
        jnp.dot(f_atoms_ref[...], wo_a_ref[...], preferred_element_type=f32)
        + jnp.dot(a_msg, wo_m_ref[...], preferred_element_type=f32)
        + bo_ref[...], 0.0)                                              # (NAp, H)
    # mol_vecs[i] = dop[i] * sum_a w_atoms[a]*atom_h[a] / sum_a w_atoms[a]
    #   = R01(0/1) @ (atom_scale * atom_h)   (per-atom f32 scale on the VPU)
    out_ref[...] = jnp.dot(r01, atom_scale_ref[...] * atom_h,
                           preferred_element_type=f32)


def mpn_encoder_pallas(f_atoms, f_bonds, w_atoms, w_bonds, a2b, b2a, b2revb,
                       a_scope, dop, Wi, Wh, Wo, bo):
    f_atoms = np.asarray(f_atoms, np.float32)
    f_bonds = np.asarray(f_bonds, np.float32)
    w_atoms = np.asarray(w_atoms, np.float32)
    w_bonds = np.asarray(w_bonds, np.float32)
    a2b = np.asarray(a2b, np.int64)
    b2a = np.asarray(b2a, np.int64)
    b2revb = np.asarray(b2revb, np.int64)
    dop = np.asarray(dop, np.float32)

    NA, NB = f_atoms.shape[0], f_bonds.shape[0]
    NM = len(a_scope)

    # chemprop BatchMolGraph pairing invariant: bond 0 is padding and directed bonds
    # come in reverse pairs rev(2k+1) == 2k+2, rev(2k+2) == 2k+1.
    n_real = NB - 1
    assert n_real % 2 == 0 and int(b2revb[0]) == 0, "unexpected bond layout"
    assert np.array_equal(b2revb[1::2], np.arange(2, NB, 2)), "rev-pair invariant broken"
    assert np.array_equal(b2revb[2::2], np.arange(1, NB, 2)), "rev-pair invariant broken"

    # Bond-row layout: the two members of each reverse pair sit exactly NBr/2 rows
    # apart, so message[b2revb] is a static half-rotation along the sublane axis.
    n_pairs = n_real // 2
    half = _round_up(n_pairs + 1, 8)        # row 0 of each half reserved for padding
    NBr = 2 * half
    bond_row = np.zeros(NB, np.int64)       # old bond index -> padded row
    k = np.arange(n_pairs)
    bond_row[1 + 2 * k] = 1 + k
    bond_row[2 + 2 * k] = half + 1 + k

    NAp = _round_up(NA, 8)
    NMp = _round_up(max(NM, 1), 8)          # sublane-friendly output rows

    f_bonds_p = np.zeros((NBr, BOND_FDIM), np.float32); f_bonds_p[bond_row] = f_bonds
    w_bonds_p = np.zeros((NBr, 1), np.float32);         w_bonds_p[bond_row, 0] = w_bonds
    f_atoms_p = np.zeros((NAp, ATOM_FDIM), np.float32); f_atoms_p[:NA] = f_atoms

    # 0/1 incidence matrices (vectorized construction; padding entries of a2b point at
    # bond 0 whose message is identically zero, so they are skipped).
    A2B = np.zeros((NAp, NBr), np.float32)
    a_idx = np.repeat(np.arange(NA), a2b.shape[1])
    b_flat = a2b.reshape(-1)
    m = b_flat != 0
    A2B[a_idx[m], bond_row[b_flat[m]]] = 1.0
    B2A = np.zeros((NBr, NAp), np.float32)
    B2A[bond_row, b2a] = 1.0

    # Readout: 0/1 molecule-membership matrix + per-atom f32 scale folding w_atoms,
    # the 'mean' normalization and degree_of_polym.
    R01 = np.zeros((NMp, NAp), np.float32)
    atom_scale = np.zeros((NAp, 1), np.float32)
    for i, (st, sz) in enumerate(a_scope):  # O(num_molecules) only
        if sz == 0:
            continue                        # zero row == cached_zero_vector
        R01[i, st:st + sz] = 1.0
        w = w_atoms[st:st + sz]
        atom_scale[st:st + sz, 0] = dop[i] * w / w.sum()

    Wi = np.asarray(Wi, np.float32); Wh = np.asarray(Wh, np.float32)
    Wo = np.asarray(Wo, np.float32); bo = np.asarray(bo, np.float32)
    wo_a, wo_m = Wo[:ATOM_FDIM], Wo[ATOM_FDIM:]

    f32, bf16 = jnp.float32, jnp.bfloat16
    args = [
        jnp.asarray(f_bonds_p, f32), jnp.asarray(f_atoms_p, f32),
        jnp.asarray(w_bonds_p, f32),
        jnp.asarray(Wi, f32), jnp.asarray(Wh, f32),
        jnp.asarray(wo_a, f32), jnp.asarray(wo_m, f32),
        jnp.asarray(bo.reshape(1, HIDDEN), f32),
        jnp.asarray(A2B, bf16),             # 0/1 -> exact in bf16, half the bytes moved
        jnp.asarray(B2A, bf16),
        jnp.asarray(R01, bf16),
        jnp.asarray(atom_scale, f32),
    ]

    out_bytes = NMp * HIDDEN * 4
    arg_bytes = sum(int(np.prod(a.shape)) * a.dtype.itemsize for a in args)
    # all-resident buffers + headroom for f32 upcasts/intermediates; stays well below
    # physical VMEM on every generation (64 MiB on v7x).
    vmem_limit = int(min(56 * 1024 * 1024,
                         max(8 * 1024 * 1024, 6 * (arg_bytes + out_bytes))))

    vmem = pl.BlockSpec(memory_space=pltpu.MemorySpace.VMEM)
    out = pl.pallas_call(
        mpn_kernel,
        out_shape=jax.ShapeDtypeStruct((NMp, HIDDEN), jnp.float32),
        in_specs=[vmem] * len(args),
        out_specs=vmem,
        compiler_params=pltpu.CompilerParams(vmem_limit_bytes=vmem_limit),
    )(*args)
    return out[:NM]


def reference_forward(f_atoms, f_bonds, w_atoms, w_bonds, a2b, b2a, b2revb,
                      a_scope, dop, Wi, Wh, Wo, bo):
    """Literal pure-JAX translation of the PyTorch forward (gather semantics)."""
    f_atoms = jnp.asarray(f_atoms); f_bonds = jnp.asarray(f_bonds)
    w_atoms = jnp.asarray(w_atoms); w_bonds = jnp.asarray(w_bonds)
    Wi = jnp.asarray(Wi); Wh = jnp.asarray(Wh); Wo = jnp.asarray(Wo); bo = jnp.asarray(bo)
    inp = f_bonds @ Wi
    message = jnp.maximum(inp, 0.0)
    for _ in range(DEPTH - 1):
        nei_msg = message[a2b]                       # (NA, max_nb, H)
        nei_w = w_bonds[a2b]                         # (NA, max_nb)
        a_msg = (nei_msg * nei_w[..., None]).sum(axis=1)
        rev = message[b2revb]
        msg = a_msg[b2a] - rev * w_bonds[:, None]
        message = jnp.maximum(inp + msg @ Wh, 0.0)
    nei_msg = message[a2b]
    nei_w = w_bonds[a2b]
    a_msg = (nei_msg * nei_w[..., None]).sum(axis=1)
    a_input = jnp.concatenate([f_atoms, a_msg], axis=1)
    atom_h = jnp.maximum(a_input @ Wo + bo, 0.0)
    vecs = []
    for i, (st, sz) in enumerate(a_scope):
        cur = atom_h[st:st + sz]
        w = w_atoms[st:st + sz]
        v = (w[:, None] * cur).sum(axis=0) / w.sum()
        vecs.append(dop[i] * v)
    return jnp.stack(vecs)


def build_graph():
    # 2 molecules: a 5-atom chain and a 5-atom ring (chemprop padding atom/bond at idx 0)
    mols = [
        (5, [(0, 1), (1, 2), (2, 3), (3, 4)]),
        (5, [(0, 1), (1, 2), (2, 3), (3, 4), (4, 0)]),
    ]
    a2b_list = [[]]          # atom 0 = padding atom
    b2a = [0]                # bond 0 = padding bond
    b2revb = [0]
    a_scope = []
    atom_off, bond_idx = 1, 1
    for n_at, edges in mols:
        a_scope.append((atom_off, n_at))
        a2b_list.extend([[] for _ in range(n_at)])
        for (u, v) in edges:
            au, av = atom_off + u, atom_off + v
            b1, b2 = bond_idx, bond_idx + 1
            bond_idx += 2
            b2a.append(au); a2b_list[av].append(b1)    # b1: au -> av (incoming to av)
            b2a.append(av); a2b_list[au].append(b2)    # b2: av -> au (incoming to au)
            b2revb.extend([b2, b1])
        atom_off += n_at
    n_atoms, n_bonds = atom_off, bond_idx
    max_nb = max(len(x) for x in a2b_list)
    a2b = np.zeros((n_atoms, max_nb), np.int32)
    for a, lst in enumerate(a2b_list):
        a2b[a, :len(lst)] = lst
    return (n_atoms, n_bonds, a2b, np.array(b2a, np.int32),
            np.array(b2revb, np.int32), a_scope)


if __name__ == "__main__":
    n_atoms, n_bonds, a2b, b2a, b2revb, a_scope = build_graph()
    n_mols = len(a_scope)

    key = jax.random.PRNGKey(0)
    ks = jax.random.split(key, 8)
    f_atoms = np.array(jax.random.normal(ks[0], (n_atoms, ATOM_FDIM), jnp.float32)); f_atoms[0] = 0.0
    f_bonds = np.array(jax.random.normal(ks[1], (n_bonds, BOND_FDIM), jnp.float32)); f_bonds[0] = 0.0
    w_atoms = np.array(jax.random.uniform(ks[2], (n_atoms,), jnp.float32, 0.5, 1.5)); w_atoms[0] = 1.0
    w_bonds = np.array(jax.random.uniform(ks[3], (n_bonds,), jnp.float32, 0.5, 1.5)); w_bonds[0] = 1.0
    dop = np.array(jax.random.uniform(ks[4], (n_mols,), jnp.float32, 0.5, 2.0))

    # deterministic synthetic parameters (W_i / W_h bias=False; W_o has bias)
    Wi = np.array(jax.random.normal(ks[5], (BOND_FDIM, HIDDEN), jnp.float32)) * 0.1
    Wh = np.array(jax.random.normal(ks[6], (HIDDEN, HIDDEN), jnp.float32)) * 0.1
    Wo = np.array(jax.random.normal(ks[7], (ATOM_FDIM + HIDDEN, HIDDEN), jnp.float32)) * 0.1
    bo = np.full((HIDDEN,), 0.01, np.float32)

    out = mpn_encoder_pallas(f_atoms, f_bonds, w_atoms, w_bonds, a2b, b2a, b2revb,
                             a_scope, dop, Wi, Wh, Wo, bo)
    out = jax.block_until_ready(out)

    ref = reference_forward(f_atoms, f_bonds, w_atoms, w_bonds, a2b, b2a, b2revb,
                            a_scope, dop, Wi, Wh, Wo, bo)
    assert out.shape == (n_mols, HIDDEN)
    assert np.allclose(np.asarray(out), np.asarray(ref), atol=1e-4, rtol=1e-4), \
        "Pallas output does not match reference"
    print("KERNEL_OK")
</pallas_src>

<mosaic_0001>
module attributes {stable_mosaic.version = 11 : i64} {
  func.func @mpn_kernel(%arg0: memref<32x32xf32, #tpu.memory_space<vmem>>, %arg1: memref<16x16xf32, #tpu.memory_space<vmem>>, %arg2: memref<32x1xf32, #tpu.memory_space<vmem>>, %arg3: memref<32x32xf32, #tpu.memory_space<vmem>>, %arg4: memref<32x32xf32, #tpu.memory_space<vmem>>, %arg5: memref<16x32xf32, #tpu.memory_space<vmem>>, %arg6: memref<32x32xf32, #tpu.memory_space<vmem>>, %arg7: memref<1x32xf32, #tpu.memory_space<vmem>>, %arg8: memref<16x32xbf16, #tpu.memory_space<vmem>>, %arg9: memref<32x16xbf16, #tpu.memory_space<vmem>>, %arg10: memref<8x16xbf16, #tpu.memory_space<vmem>>, %arg11: memref<16x1xf32, #tpu.memory_space<vmem>>, %arg12: memref<8x32xf32, #tpu.memory_space<vmem>>) attributes {dimension_semantics = [], scalar_prefetch = 0 : i64, scratch_operands = 0 : i64, tpu.core_type = #tpu.core_type<tc>} {
    %c0 = arith.constant 0 : index
    %c0_0 = arith.constant 0 : index
    %0 = vector.load %arg8[%c0, %c0_0] : memref<16x32xbf16, #tpu.memory_space<vmem>>, vector<16x32xbf16>
    %1 = arith.extf %0 : vector<16x32xbf16> to vector<16x32xf32>
    %c0_1 = arith.constant 0 : index
    %c0_2 = arith.constant 0 : index
    %2 = vector.load %arg9[%c0_1, %c0_2] : memref<32x16xbf16, #tpu.memory_space<vmem>>, vector<32x16xbf16>
    %3 = arith.extf %2 : vector<32x16xbf16> to vector<32x16xf32>
    %c0_3 = arith.constant 0 : index
    %c0_4 = arith.constant 0 : index
    %4 = vector.load %arg10[%c0_3, %c0_4] : memref<8x16xbf16, #tpu.memory_space<vmem>>, vector<8x16xbf16>
    %5 = arith.extf %4 : vector<8x16xbf16> to vector<8x16xf32>
    %c0_5 = arith.constant 0 : index
    %c0_6 = arith.constant 0 : index
    %6 = vector.load %arg2[%c0_5, %c0_6] : memref<32x1xf32, #tpu.memory_space<vmem>>, vector<32x1xf32>
    %c0_7 = arith.constant 0 : index
    %c0_8 = arith.constant 0 : index
    %7 = vector.load %arg0[%c0_7, %c0_8] : memref<32x32xf32, #tpu.memory_space<vmem>>, vector<32x32xf32>
    %c0_9 = arith.constant 0 : index
    %c0_10 = arith.constant 0 : index
    %8 = vector.load %arg3[%c0_9, %c0_10] : memref<32x32xf32, #tpu.memory_space<vmem>>, vector<32x32xf32>
    %cst = arith.constant dense<0.000000e+00> : vector<32x32xf32>
    %9 = tpu.matmul %7, %8, %cst {dimension_numbers = #tpu.dot_dimension_numbers<[1], [0], [0], [1], [0, 0, 1, 1], [], []>} : vector<32x32xf32>, vector<32x32xf32>, vector<32x32xf32> -> vector<32x32xf32>
    %cst_11 = arith.constant 0.000000e+00 : f32
    %10 = vector.broadcast %cst_11 : f32 to vector<32x32xf32>
    %11 = arith.maximumf %9, %10 : vector<32x32xf32>
    %12 = vector.broadcast %6 : vector<32x1xf32> to vector<32x32xf32>
    %13 = arith.mulf %11, %12 : vector<32x32xf32>
    %cst_12 = arith.constant dense<0.000000e+00> : vector<16x32xf32>
    %14 = tpu.matmul %1, %13, %cst_12 {dimension_numbers = #tpu.dot_dimension_numbers<[1], [0], [0], [1], [0, 0, 1, 1], [], []>} : vector<16x32xf32>, vector<32x32xf32>, vector<16x32xf32> -> vector<16x32xf32>
    %15 = vector.extract_strided_slice %11 {offsets = [16, 0], sizes = [16, 32], strides = [1, 1]} : vector<32x32xf32> to vector<16x32xf32>
    %16 = vector.extract_strided_slice %11 {offsets = [0, 0], sizes = [16, 32], strides = [1, 1]} : vector<32x32xf32> to vector<16x32xf32>
    %17 = tpu.concatenate %15, %16 in 0 : vector<16x32xf32>, vector<16x32xf32> -> vector<32x32xf32>
    %cst_13 = arith.constant dense<0.000000e+00> : vector<32x32xf32>
    %18 = tpu.matmul %3, %14, %cst_13 {dimension_numbers = #tpu.dot_dimension_numbers<[1], [0], [0], [1], [0, 0, 1, 1], [], []>} : vector<32x16xf32>, vector<16x32xf32>, vector<32x32xf32> -> vector<32x32xf32>
    %19 = vector.broadcast %6 : vector<32x1xf32> to vector<32x32xf32>
    %20 = arith.mulf %17, %19 : vector<32x32xf32>
    %21 = arith.subf %18, %20 : vector<32x32xf32>
    %c0_14 = arith.constant 0 : index
    %c0_15 = arith.constant 0 : index
    %22 = vector.load %arg4[%c0_14, %c0_15] : memref<32x32xf32, #tpu.memory_space<vmem>>, vector<32x32xf32>
    %cst_16 = arith.constant dense<0.000000e+00> : vector<32x32xf32>
    %23 = tpu.matmul %21, %22, %cst_16 {dimension_numbers = #tpu.dot_dimension_numbers<[1], [0], [0], [1], [0, 0, 1, 1], [], []>} : vector<32x32xf32>, vector<32x32xf32>, vector<32x32xf32> -> vector<32x32xf32>
    %24 = arith.addf %9, %23 : vector<32x32xf32>
    %cst_17 = arith.constant 0.000000e+00 : f32
    %25 = vector.broadcast %cst_17 : f32 to vector<32x32xf32>
    %26 = arith.maximumf %24, %25 : vector<32x32xf32>
    %27 = vector.broadcast %6 : vector<32x1xf32> to vector<32x32xf32>
    %28 = arith.mulf %26, %27 : vector<32x32xf32>
    %cst_18 = arith.constant dense<0.000000e+00> : vector<16x32xf32>
    %29 = tpu.matmul %1, %28, %cst_18 {dimension_numbers = #tpu.dot_dimension_numbers<[1], [0], [0], [1], [0, 0, 1, 1], [], []>} : vector<16x32xf32>, vector<32x32xf32>, vector<16x32xf32> -> vector<16x32xf32>
    %30 = vector.extract_strided_slice %26 {offsets = [16, 0], sizes = [16, 32], strides = [1, 1]} : vector<32x32xf32> to vector<16x32xf32>
    %31 = vector.extract_strided_slice %26 {offsets = [0, 0], sizes = [16, 32], strides = [1, 1]} : vector<32x32xf32> to vector<16x32xf32>
    %32 = tpu.concatenate %30, %31 in 0 : vector<16x32xf32>, vector<16x32xf32> -> vector<32x32xf32>
    %cst_19 = arith.constant dense<0.000000e+00> : vector<32x32xf32>
    %33 = tpu.matmul %3, %29, %cst_19 {dimension_numbers = #tpu.dot_dimension_numbers<[1], [0], [0], [1], [0, 0, 1, 1], [], []>} : vector<32x16xf32>, vector<16x32xf32>, vector<32x32xf32> -> vector<32x32xf32>
    %34 = vector.broadcast %6 : vector<32x1xf32> to vector<32x32xf32>
    %35 = arith.mulf %32, %34 : vector<32x32xf32>
    %36 = arith.subf %33, %35 : vector<32x32xf32>
    %c0_20 = arith.constant 0 : index
    %c0_21 = arith.constant 0 : index
    %37 = vector.load %arg4[%c0_20, %c0_21] : memref<32x32xf32, #tpu.memory_space<vmem>>, vector<32x32xf32>
    %cst_22 = arith.constant dense<0.000000e+00> : vector<32x32xf32>
    %38 = tpu.matmul %36, %37, %cst_22 {dimension_numbers = #tpu.dot_dimension_numbers<[1], [0], [0], [1], [0, 0, 1, 1], [], []>} : vector<32x32xf32>, vector<32x32xf32>, vector<32x32xf32> -> vector<32x32xf32>
    %39 = arith.addf %9, %38 : vector<32x32xf32>
    %cst_23 = arith.constant 0.000000e+00 : f32
    %40 = vector.broadcast %cst_23 : f32 to vector<32x32xf32>
    %41 = arith.maximumf %39, %40 : vector<32x32xf32>
    %42 = vector.broadcast %6 : vector<32x1xf32> to vector<32x32xf32>
    %43 = arith.mulf %41, %42 : vector<32x32xf32>
    %cst_24 = arith.constant dense<0.000000e+00> : vector<16x32xf32>
    %44 = tpu.matmul %1, %43, %cst_24 {dimension_numbers = #tpu.dot_dimension_numbers<[1], [0], [0], [1], [0, 0, 1, 1], [], []>} : vector<16x32xf32>, vector<32x32xf32>, vector<16x32xf32> -> vector<16x32xf32>
    %c0_25 = arith.constant 0 : index
    %c0_26 = arith.constant 0 : index
    %45 = vector.load %arg1[%c0_25, %c0_26] : memref<16x16xf32, #tpu.memory_space<vmem>>, vector<16x16xf32>
    %c0_27 = arith.constant 0 : index
    %c0_28 = arith.constant 0 : index
    %46 = vector.load %arg5[%c0_27, %c0_28] : memref<16x32xf32, #tpu.memory_space<vmem>>, vector<16x32xf32>
    %cst_29 = arith.constant dense<0.000000e+00> : vector<16x32xf32>
    %47 = tpu.matmul %45, %46, %cst_29 {dimension_numbers = #tpu.dot_dimension_numbers<[1], [0], [0], [1], [0, 0, 1, 1], [], []>} : vector<16x16xf32>, vector<16x32xf32>, vector<16x32xf32> -> vector<16x32xf32>
    %c0_30 = arith.constant 0 : index
    %c0_31 = arith.constant 0 : index
    %48 = vector.load %arg6[%c0_30, %c0_31] : memref<32x32xf32, #tpu.memory_space<vmem>>, vector<32x32xf32>
    %cst_32 = arith.constant dense<0.000000e+00> : vector<16x32xf32>
    %49 = tpu.matmul %44, %48, %cst_32 {dimension_numbers = #tpu.dot_dimension_numbers<[1], [0], [0], [1], [0, 0, 1, 1], [], []>} : vector<16x32xf32>, vector<32x32xf32>, vector<16x32xf32> -> vector<16x32xf32>
    %50 = arith.addf %47, %49 : vector<16x32xf32>
    %c0_33 = arith.constant 0 : index
    %c0_34 = arith.constant 0 : index
    %51 = vector.load %arg7[%c0_33, %c0_34] : memref<1x32xf32, #tpu.memory_space<vmem>>, vector<1x32xf32>
    %52 = vector.broadcast %51 : vector<1x32xf32> to vector<16x32xf32>
    %53 = arith.addf %50, %52 : vector<16x32xf32>
    %cst_35 = arith.constant 0.000000e+00 : f32
    %54 = vector.broadcast %cst_35 : f32 to vector<16x32xf32>
    %55 = arith.maximumf %53, %54 : vector<16x32xf32>
    %c0_36 = arith.constant 0 : index
    %c0_37 = arith.constant 0 : index
    %56 = vector.load %arg11[%c0_36, %c0_37] : memref<16x1xf32, #tpu.memory_space<vmem>>, vector<16x1xf32>
    %57 = vector.broadcast %56 : vector<16x1xf32> to vector<16x32xf32>
    %58 = arith.mulf %57, %55 : vector<16x32xf32>
    %cst_38 = arith.constant dense<0.000000e+00> : vector<8x32xf32>
    %59 = tpu.matmul %5, %58, %cst_38 {dimension_numbers = #tpu.dot_dimension_numbers<[1], [0], [0], [1], [0, 0, 1, 1], [], []>} : vector<8x16xf32>, vector<16x32xf32>, vector<8x32xf32> -> vector<8x32xf32>
    %c0_39 = arith.constant 0 : index
    %c0_40 = arith.constant 0 : index
    %60 = vector.load %arg12[%c0_39, %c0_40] : memref<8x32xf32, #tpu.memory_space<vmem>>, vector<8x32xf32>
    tpu.vector_store %arg12[%c0_39, %c0_40], %59 {strides = array<i32>} : memref<8x32xf32, #tpu.memory_space<vmem>>, vector<8x32xf32>,
    return
  }
}

</mosaic_0001>

<bundles_post_ra>
// kernel: tpu_custom_call.1
= control target key start
LH: loop header
LB: loop body
LE: loop exit
PB: predicated region body
PF: predicated region fallthrough
CT: control target
= control target key end

     0   :  { %17 = vsyncpa [#allocation3], 0  ;;  %s1109_s0 = inlined_call_operand.vmem [shape: f32[32,32], index: 0, kind: input, shape index: {}]   ;;  %s1110_s1 = inlined_call_operand.hbm [shape: f32[16,16], index: 1, kind: input, shape index: {}]   ;;  %s1111_s2 = inlined_call_operand.vmem [shape: f32[32,1], index: 2, kind: input, shape index: {}]   ;;  %s1112_s3 = inlined_call_operand.vmem [shape: f32[32,32], index: 3, kind: input, shape index: {}]   ;;  %s1113_s4 = inlined_call_operand.hbm [shape: f32[32,32], index: 4, kind: input, shape index: {}]   ;;  %s1114_s5 = inlined_call_operand.hbm [shape: f32[16,32], index: 5, kind: input, shape index: {}]   ;;  %s1115_s6 = inlined_call_operand.hbm [shape: f32[32,32], index: 6, kind: input, shape index: {}]   ;;  %s1116_s7 = inlined_call_operand.hbm [shape: f32[1,32], index: 7, kind: input, shape index: {}]   ;;  %s1117_s8 = inlined_call_operand.vmem [shape: bf16[16,32], index: 8, kind: input, shape index: {}]   ;;  %s1118_s9 = inlined_call_operand.vmem [shape: bf16[32,16], index: 9, kind: input, shape index: {}]   ;;  %s1119_s10 = inlined_call_operand.hbm [shape: bf16[8,16], index: 10, kind: input, shape index: {}]   ;;  %s1120_s11 = inlined_call_operand.vmem [shape: f32[16,1], index: 11, kind: input, shape index: {}]   ;;  %s1121_s12 = inlined_call_operand.hbm [shape: f32[8,32], index: 12, kind: output, shape index: {}]  }
   0x1   :  { %18 = vsyncpa [#allocation6], 0 }
   0x2   :  { %19 = vsyncpa [#allocation9], 0 }
   0x3   :  { %20 = vsyncpa [#allocation12], 0 }
   0x4   :  { %21 = vsyncpa [#allocation4], 0  ;;  %s45_s23 = sshll.u32 %s1113_s4, 4  ;;  %s868_s24 = smov [#allocation5]   ;;  %s46_s23 = int_to_ptr.hbm [resolvable:$true] %s45_s23 }
   0x5   :  { %s47_s25 = sshll.u32 %s868_s24, 4  ;;  %s71_s28 = sshll.u32 %s1115_s6, 4  ;;  %s48_s25 = int_to_ptr.vmem [resolvable:$true] %s47_s25  ;;  %s72_s28 = int_to_ptr.hbm [resolvable:$true] %s71_s28 }
   0x6   :  { %s869_s29 = smov 128   ;;  %s870_s30 = smov 8  }
   0x7   :  { %53 = dma.hbm_to_vmem [thread:$0]  %s46_s23, 512, %s48_s25, [#allocation6], %s869_s29, %s869_s29, %s870_s30  }
   0x8   :  { %s871_s13 = smov [#allocation8]   ;;  %s28_s17 = sshll.u32 %s1110_s1, 4  ;;  %s29_s17 = int_to_ptr.hbm [resolvable:$true] %s28_s17 }
   0x9   :  { %s73_s14 = sshll.u32 %s871_s13, 4  ;;  %s58_s19 = sshll.u32 %s1114_s5, 4  ;;  %s74_s14 = int_to_ptr.vmem [resolvable:$true] %s73_s14  ;;  %s59_s19 = int_to_ptr.hbm [resolvable:$true] %s58_s19 }
   0xa   :  { %79 = dma.hbm_to_vmem [thread:$0]  %s72_s28, 512, %s74_s14, [#allocation9], %s869_s29, %s869_s29, %s870_s30  }
   0xb   :  { %s872_s20 = smov [#allocation2]   ;;  %s873_s6 = smov [#allocation7]  }
   0xc   :  { %s30_s21 = sshll.u32 %s872_s20, 4  ;;  %s60_s22 = sshll.u32 %s873_s6, 4  ;;  %s31_s21 = int_to_ptr.vmem [resolvable:$true] %s30_s21  ;;  %s61_s22 = int_to_ptr.vmem [resolvable:$true] %s60_s22 }
   0xd   :  { %36 = dma.hbm_to_vmem [thread:$0]  %s29_s17, 256, %s31_s21, [#allocation3], %s869_s29, %s869_s29, %s870_s30  }
   0xe   :  { %s85_s25 = sshll.u32 %s1116_s7, 4  ;;  %s100_s27 = sshll.u32 %s1119_s10, 4  ;;  %s86_s25 = int_to_ptr.hbm [resolvable:$true] %s85_s25  ;;  %s101_s27 = int_to_ptr.hbm [resolvable:$true] %s100_s27 }
   0xf   :  { %66 = dma.hbm_to_vmem [thread:$0]  %s59_s19, 256, %s61_s22, [#allocation6], %s869_s29, %s869_s29, %s870_s30  }
  0x10   :  { %s874_s28 = smov [#allocation10]   ;;  %s875_s13 = smov [#allocation11]  }
  0x11   :  { %s87_s5 = sshll.u32 %s874_s28, 4  ;;  %s102_s14 = sshll.u32 %s875_s13, 4  ;;  %s88_s5 = int_to_ptr.vmem [resolvable:$true] %s87_s5  ;;  %s103_s14 = int_to_ptr.vmem [resolvable:$true] %s102_s14 }
  0x12   :  { %90 = dma.hbm_to_vmem [thread:$0]  %s86_s25, 16, %s88_s5, [#allocation9]  }
  0x13   :  { %105 = dma.hbm_to_vmem [thread:$0]  %s101_s27, 64, %s103_s14, [#allocation12]  }
  0x14   :  { %858 = dma.done.wait [#allocation3], 256  }
  0x15   :  { %859 = vsyncadd [#allocation3], 4294967040 }
  0x16   :  { %860 = dma.done.wait [#allocation6], 768  }
  0x17   :  { %861 = vsyncadd [#allocation6], 4294966528 }
  0x18   :  { %862 = dma.done.wait [#allocation9], 528  }
  0x19   :  { %863 = vsyncadd [#allocation9], 4294966768 }
  0x1a   :  { %864 = dma.done.wait [#allocation12], 64  }
  0x1b   :  { %865 = vsyncadd [#allocation12], 4294967232  ;;  %v876_v0 = vmov 0   ;;  %v157_v1 = vld [vmem:[%s1112_s3 + $0x18] sm:$0xff]  ;;  %v156_v2 = vld [vmem:[%s1112_s3 + $0x10] sm:$0xff]  ;;  %vm158_vm0 = vcmask 261120  }
  0x1c   :  { %687 = vset.pattern.permute.xlu1 %v876_v0  ;;  %686 = vset.pattern.permute.xlu0 %v876_v0  ;;  %v149_v3 = vld [vmem:[%s1111_s2 + $0x18] sm:$0xff]  ;;  %v155_v4 = vld [vmem:[%s1112_s3 + $0x8] sm:$0xff]  ;;  %v154_v6 = vld [vmem:[%s1112_s3] sm:$0xff]  ;;  %vm257_vm1 = vcmask 130048   ;;  %s619_s18 = sshll.u32 %s1121_s12, 4  ;;  %s620_s18 = int_to_ptr.hbm [resolvable:$true] %s619_s18 }
  0x1d   :  { %688 = vset.pattern.permute.xlu2 %v876_v0  ;;  %183 = vmatpush.msra.mxu0 %v157_v1  ;;  %v147_v5 = vld [vmem:[%s1111_s2 + $0x8] sm:$0xff]  ;;  %v150_v7 = vld [vmem:[%s1109_s0] sm:$0xff]  ;;  %v148_v8 = vld [vmem:[%s1111_s2 + $0x10] sm:$0xff] }
  0x1e   :  { %221 = vperm.xlu0 %686, %v149_v3   ;;  %211 = vperm.xlu1 %687, %v147_v5   ;;  %v146_v9 = vld [vmem:[%s1111_s2] sm:$0xff]  ;;  %v151_v10 = vld [vmem:[%s1109_s0 + $0x8] sm:$0xff]  ;;  %v152_v11 = vld [vmem:[%s1109_s0 + $0x10] sm:$0xff] }
  0x1f   :  { %184 = vmatpush.msra.mxu0 %v156_v2  ;;  %v153_v12 = vld [vmem:[%s1109_s0 + $0x18] sm:$0xff]  ;;  %v664_v26 = vld [vmem:[%s1117_s8] sm:$0xff]   ;;  %v310_v33 = vld [vmem:[#allocation5 + $0x18] sm:$0xff] }
  0x20   :  { %v1027_v29 = vunpack.c.l.bf16 %v664_v26  ;;  %v1032_v31 = vunpack.c.h.bf16 %v664_v26  ;;  %v309_v34 = vld [vmem:[#allocation5 + $0x10] sm:$0xff]  ;;  %335 = vmatpush.msra.mxu3 %v310_v33  ;;  %v675_v39 = vld [vmem:[%s1118_s9 + $0x8] sm:$0xff]   ;;  %v308_v42 = vld [vmem:[#allocation5 + $0x8] sm:$0xff] }
  0x21   :  { %185 = vmatpush.msra.mxu0 %v155_v4  ;;  %v1039_v35 = vld [vmem:[%s1118_s9] sm:$0xff]   ;;  %v673_v40 = vunpack.c.l.bf16 %v675_v39  ;;  %v674_v41 = vunpack.c.h.bf16 %v675_v39  ;;  %v307_v43 = vld [vmem:[#allocation5] sm:$0xff] }
  0x22   :  { %336 = vmatpush.msra.mxu3 %v309_v34  ;;  %v669_v37 = vunpack.c.l.bf16 %v1039_v35  ;;  %v670_v38 = vunpack.c.h.bf16 %v1039_v35  ;;  %v506_v35 = vld [vmem:[#allocation8 + $0x10] sm:$0xff] }
  0x23   :  { %186 = vmatpush.msra.mxu0 %v154_v6 }
  0x24   :  { %632 = vmatmul.msk.f32.vlgmr.msra.gmra.mxu0 %vm158_vm0, %v150_v7  ;;  %337 = vmatpush.msra.mxu3 %v308_v42 }
  0x25   :  { %448 = vmatpush.msrb.mxu0 %v310_v33 }
  0x26   :  { %216 = vperm.xlu0 %686, %v148_v8   ;;  %206 = vperm.xlu1 %687, %v146_v9  }
  0x27   :  { %449 = vmatpush.msrb.mxu0 %v309_v34  ;;  %338 = vmatpush.msra.mxu3 %v307_v43  ;;  %v507_v34 = vld [vmem:[#allocation8 + $0x18] sm:$0xff] }
  0x29   :  { %450 = vmatpush.msrb.mxu0 %v308_v42  ;;  %526 = vmatpush.msrb.mxu3 %v507_v34 }
  0x2b   :  { %451 = vmatpush.msrb.mxu0 %v307_v43  ;;  %527 = vmatpush.msrb.mxu3 %v506_v35 }
  0x2c   :  { %633 = vmatmul.msk.f32.gmra.mxu0 %vm158_vm0, %v151_v10 }
  0x34   :  { %634 = vmatmul.msk.f32.gmra.mxu0 %vm158_vm0, %v152_v11 }
  0x3c   :  { %635 = vmatmul.msk.f32.gmra.mxu0 %vm158_vm0, %v153_v12 }
  0x90   :  { %v1007_v16 = vpop.permute.xlu0 %221  ;;  %v1009_v17 = vpop.permute.xlu1 %211 }
  0x98   :  { %v1017_v23 = vpop.permute.xlu0 %216  ;;  %v1024_v27 = vpop.permute.xlu1 %206 }
  0xa1   :  { %v1001_v13 = vpop.f32.mrf.mxu0 }
  0xa2   :  { %v200_v25 = vmax.f32 %v1001_v13, 0.0 }
  0xa4   :  { %v224_v30 = vmul.f32 %v1024_v27, %v200_v25  ;;  %v301_v50 = vmul.f32 %v1017_v23, %v200_v25 }
  0xa9   :  { %v1003_v14 = vpop.f32.mrf.mxu0 }
  0xaa   :  { %v201_v22 = vmax.f32 %v1003_v14, 0.0 }
  0xac   :  { %v225_v28 = vmul.f32 %v1009_v17, %v201_v22  ;;  %v302_v53 = vmul.f32 %v1007_v16, %v201_v22 }
  0xb1   :  { %v1005_v15 = vpop.f32.mrf.mxu0 }
  0xb2   :  { %v202_v20 = vmax.f32 %v1005_v15, 0.0 }
  0xb4   :  { %v226_v24 = vmul.f32 %v1017_v23, %v202_v20  ;;  %v299_v44 = vmul.f32 %v1024_v27, %v202_v20 }
  0xb9   :  { %v1011_v18 = vpop.f32.mrf.mxu0 }
  0xba   :  { %v203_v19 = vmax.f32 %v1011_v18, 0.0 }
  0xbc   :  { %v227_v21 = vmul.f32 %v1007_v16, %v203_v19  ;;  %v300_v47 = vmul.f32 %v1009_v17, %v203_v19 }
  0xbe   :  { %246 = vmatpush.msra.mxu1 %v227_v21 }
  0xc0   :  { %247 = vmatpush.msra.mxu1 %v226_v24 }
  0xc2   :  { %248 = vmatpush.msra.mxu1 %v225_v28 }
  0xc4   :  { %249 = vmatpush.msra.mxu1 %v224_v30 }
  0xc5   :  { %636 = vmatmul.msk.f32.vlgmr.msra.gmra.mxu1 %vm158_vm0, %v1027_v29 }
  0xcd   :  { %637 = vmatmul.msk.f32.gmra.mxu1 %vm158_vm0, %v1032_v31 }
 0x142   :  { %v251_v32 = vpop.f32.mrf.mxu1 }
 0x14a   :  { %v254_v36 = vpop.f32.mrf.mxu1 }
 0x14b   :  { %284 = vmatpush.msra.mxu2 %v254_v36 }
 0x14d   :  { %285 = vmatpush.msra.mxu2 %v251_v32 }
 0x14e   :  { %638 = vmatmul.msk.f32.vlgmr.msra.gmra.mxu2 %vm257_vm1, %v669_v37 }
 0x156   :  { %639 = vmatmul.msk.f32.gmra.mxu2 %vm257_vm1, %v670_v38 }
 0x15e   :  { %640 = vmatmul.msk.f32.gmra.mxu2 %vm257_vm1, %v673_v40 }
 0x166   :  { %641 = vmatmul.msk.f32.gmra.mxu2 %vm257_vm1, %v674_v41 }
 0x1d1   :  { %v287_v45 = vpop.f32.mrf.mxu2 }
 0x1d2   :  { %v303_v46 = vsub.f32 %v287_v45, %v299_v44 }
 0x1d4   :  { %642 = vmatmul.msk.f32.vlgmr.msra.gmra.mxu3 %vm158_vm0, %v303_v46 }
 0x1d9   :  { %v290_v48 = vpop.f32.mrf.mxu2 }
 0x1da   :  { %v304_v49 = vsub.f32 %v290_v48, %v300_v47 }
 0x1dc   :  { %643 = vmatmul.msk.f32.gmra.mxu3 %vm158_vm0, %v304_v49 }
 0x1e1   :  { %v293_v51 = vpop.f32.mrf.mxu2 }
 0x1e2   :  { %v305_v52 = vsub.f32 %v293_v51, %v301_v50 }
 0x1e4   :  { %644 = vmatmul.msk.f32.gmra.mxu3 %vm158_vm0, %v305_v52 }
 0x1e9   :  { %v296_v54 = vpop.f32.mrf.mxu2 }
 0x1ea   :  { %v306_v55 = vsub.f32 %v296_v54, %v302_v53  ;;  %v689_v54 = vld [vmem:[#allocation10] ss:$0 sm:$0xff] }
 0x1ec   :  { %645 = vmatmul.msk.f32.gmra.mxu3 %vm158_vm0, %v306_v55 }
 0x257   :  { %v340_v56 = vpop.f32.mrf.mxu3 }
 0x258   :  { %v352_v63 = vadd.f32 %v340_v56, %v1001_v13 }
 0x25a   :  { %v356_v4 = vmax.f32 %v352_v63, 0.0 }
 0x25c   :  { %v360_v7 = vmul.f32 %v356_v4, %v1024_v27  ;;  %v418_v22 = vmul.f32 %v356_v4, %v1017_v23 }
 0x25f   :  { %v343_v57 = vpop.f32.mrf.mxu3 }
 0x260   :  { %v353_v61 = vadd.f32 %v343_v57, %v1003_v14 }
 0x262   :  { %v357_v2 = vmax.f32 %v353_v61, 0.0 }
 0x264   :  { %v361_v6 = vmul.f32 %v357_v2, %v1009_v17  ;;  %v419_v26 = vmul.f32 %v357_v2, %v1007_v16 }
 0x267   :  { %v346_v58 = vpop.f32.mrf.mxu3 }
 0x268   :  { %v354_v59 = vadd.f32 %v346_v58, %v1005_v15 }
 0x26a   :  { %v358_v0 = vmax.f32 %v354_v59, 0.0 }
 0x26c   :  { %v362_v5 = vmul.f32 %v358_v0, %v1017_v23  ;;  %v416_v10 = vmul.f32 %v358_v0, %v1024_v27 }
 0x26f   :  { %v349_v60 = vpop.f32.mrf.mxu3 }
 0x270   :  { %v355_v62 = vadd.f32 %v349_v60, %v1011_v18 }
 0x272   :  { %v359_v1 = vmax.f32 %v355_v62, 0.0  ;;  %v144_v62 = vld [vmem:[#allocation11] sm:$0xf] }
 0x274   :  { %v363_v3 = vmul.f32 %v359_v1, %v1007_v16  ;;  %v417_v19 = vmul.f32 %v359_v1, %v1009_v17  ;;  %v145_v1 = vunpack.c.l.bf16 %v144_v62 }
 0x276   :  { %376 = vmatpush.msrb.mxu1 %v363_v3 }
 0x278   :  { %377 = vmatpush.msrb.mxu1 %v362_v5 }
 0x27a   :  { %378 = vmatpush.msrb.mxu1 %v361_v6 }
 0x27c   :  { %379 = vmatpush.msrb.mxu1 %v360_v7 }
 0x27d   :  { %646 = vmatmul.msk.f32.vlgmr.msrb.gmra.mxu1 %vm158_vm0, %v1027_v29 }
 0x285   :  { %647 = vmatmul.msk.f32.gmra.mxu1 %vm158_vm0, %v1032_v31 }
 0x2fa   :  { %v381_v8 = vpop.f32.mrf.mxu1 }
 0x302   :  { %v384_v9 = vpop.f32.mrf.mxu1 }
 0x303   :  { %401 = vmatpush.msrb.mxu2 %v384_v9 }
 0x305   :  { %402 = vmatpush.msrb.mxu2 %v381_v8 }
 0x306   :  { %648 = vmatmul.msk.f32.vlgmr.msrb.gmra.mxu2 %vm257_vm1, %v669_v37  ;;  %v505_v37 = vld [vmem:[#allocation8 + $0x8] sm:$0xff] }
 0x307   :  { %528 = vmatpush.msrb.mxu3 %v505_v37 }
 0x30e   :  { %649 = vmatmul.msk.f32.gmra.mxu2 %vm257_vm1, %v670_v38 }
 0x316   :  { %650 = vmatmul.msk.f32.gmra.mxu2 %vm257_vm1, %v673_v40 }
 0x31e   :  { %651 = vmatmul.msk.f32.gmra.mxu2 %vm257_vm1, %v674_v41 }
 0x389   :  { %v404_v11 = vpop.f32.mrf.mxu2 }
 0x38a   :  { %v420_v12 = vsub.f32 %v404_v11, %v416_v10 }
 0x38c   :  { %652 = vmatmul.msk.f32.vlgmr.msrb.gmra.mxu0 %vm158_vm0, %v420_v12 }
 0x391   :  { %v407_v20 = vpop.f32.mrf.mxu2 }
 0x392   :  { %v421_v21 = vsub.f32 %v407_v20, %v417_v19 }
 0x394   :  { %653 = vmatmul.msk.f32.gmra.mxu0 %vm158_vm0, %v421_v21 }
 0x399   :  { %v410_v24 = vpop.f32.mrf.mxu2 }
 0x39a   :  { %v422_v25 = vsub.f32 %v410_v24, %v418_v22 }
 0x39c   :  { %654 = vmatmul.msk.f32.gmra.mxu0 %vm158_vm0, %v422_v25 }
 0x3a1   :  { %v413_v28 = vpop.f32.mrf.mxu2 }
 0x3a2   :  { %v423_v30 = vsub.f32 %v413_v28, %v419_v26 }
 0x3a4   :  { %655 = vmatmul.msk.f32.gmra.mxu0 %vm158_vm0, %v423_v30 }
 0x409   :  { %v453_v32 = vpop.f32.mrf.mxu0 }
 0x40a   :  { %v465_v42 = vadd.f32 %v453_v32, %v1001_v13  ;;  %v504_v13 = vld [vmem:[#allocation8] sm:$0xff] }
 0x40b   :  { %529 = vmatpush.msrb.mxu3 %v504_v13 }
 0x40c   :  { %v469_v47 = vmax.f32 %v465_v42, 0.0 }
 0x411   :  { %v456_v33 = vpop.f32.mrf.mxu0 }
 0x412   :  { %v466_v40 = vadd.f32 %v456_v33, %v1003_v14  ;;  %v503_v14 = vld [vmem:[#allocation7 + $0x8] sm:$0xff] }
 0x414   :  { %v470_v45 = vmax.f32 %v466_v40, 0.0 }
 0x416   :  { %v474_v49 = vmul.f32 %v470_v45, %v1009_v17  ;;  %v575_v17 = vld [vmem:[%s1120_s11 + $0x8] sm:$0xff] }
 0x417   :  { %583 = vperm.xlu2 %688, %v575_v17  }
 0x419   :  { %v459_v36 = vpop.f32.mrf.mxu0 }
 0x41a   :  { %v467_v38 = vadd.f32 %v459_v36, %v1005_v15  ;;  %v473_v15 = vmul.f32 %v469_v47, %v1024_v27  ;;  %v574_v27 = vld [vmem:[%s1120_s11] sm:$0xff]  ;;  %s877_s11 = smov [#allocation13]  }
 0x41b   :  { %s617_s16 = sshll.u32 %s877_s11, 4  ;;  %s618_s16 = int_to_ptr.vmem [resolvable:$true] %s617_s16 }
 0x41c   :  { %v471_v43 = vmax.f32 %v467_v38, 0.0 }
 0x41e   :  { %v475_v48 = vmul.f32 %v471_v43, %v1017_v23  ;;  %v501_v23 = vld [vmem:[#allocation2 + $0x8] sm:$0xff] }
 0x41f   :  { %578 = vperm.xlu2 %688, %v574_v27  }
 0x421   :  { %v462_v39 = vpop.f32.mrf.mxu0 }
 0x422   :  { %v468_v41 = vadd.f32 %v462_v39, %v1011_v18  ;;  %v500_v18 = vld [vmem:[#allocation2] sm:$0xff] }
 0x424   :  { %v472_v44 = vmax.f32 %v468_v41, 0.0 }
 0x426   :  { %v476_v46 = vmul.f32 %v472_v44, %v1007_v16  ;;  %v502_v16 = vld [vmem:[#allocation7] sm:$0xff] }
 0x428   :  { %489 = vmatpush.msra.mxu1 %v476_v46 }
 0x42a   :  { %490 = vmatpush.msra.mxu1 %v475_v48 }
 0x42c   :  { %491 = vmatpush.msra.mxu1 %v474_v49 }
 0x42e   :  { %492 = vmatpush.msra.mxu1 %v473_v15 }
 0x42f   :  { %656 = vmatmul.msk.f32.vlgmr.msra.gmra.mxu1 %vm158_vm0, %v1027_v29 }
 0x430   :  { %557 = vmatpush.msrb.mxu1 %v503_v14 }
 0x432   :  { %558 = vmatpush.msrb.mxu1 %v502_v16 }
 0x437   :  { %657 = vmatmul.msk.f32.gmra.mxu1 %vm158_vm0, %v1032_v31 }
 0x43f   :  { %660 = vmatmul.msk.f32.vlgmr.msrb.gmra.mxu1 %vm257_vm1, %v500_v18 }
 0x447   :  { %661 = vmatmul.msk.f32.gmra.mxu1 %vm257_vm1, %v501_v23 }
 0x471   :  { %v584_v52 = vpop.permute.xlu2 %583 }
 0x479   :  { %v579_v63 = vpop.permute.xlu2 %578 }
 0x4ac   :  { %v494_v29 = vpop.f32.mrf.mxu1 }
 0x4ad   :  { %658 = vmatmul.msk.f32.vlgmr.msrb.gmra.mxu3 %vm158_vm0, %v494_v29 }
 0x4b4   :  { %v497_v31 = vpop.f32.mrf.mxu1 }
 0x4b5   :  { %659 = vmatmul.msk.f32.gmra.mxu3 %vm158_vm0, %v497_v31 }
 0x4bc   :  { %v560_v50 = vpop.f32.mrf.mxu1 }
 0x4c4   :  { %v563_v55 = vpop.f32.mrf.mxu1 }
 0x530   :  { %v531_v51 = vpop.f32.mrf.mxu3 }
 0x531   :  { %v561_v53 = vadd.f32 %v560_v50, %v531_v51 }
 0x533   :  { %v570_v57 = vadd.f32 %v689_v54, %v561_v53 }
 0x535   :  { %v572_v61 = vmax.f32 %v570_v57, 0.0 }
 0x537   :  { %v586_v2 = vmul.f32 %v579_v63, %v572_v61 }
 0x538   :  { %v534_v56 = vpop.f32.mrf.mxu3 }
 0x539   :  { %v564_v58 = vadd.f32 %v563_v55, %v534_v56 }
 0x53b   :  { %v571_v59 = vadd.f32 %v689_v54, %v564_v58 }
 0x53d   :  { %v573_v60 = vmax.f32 %v571_v59, 0.0 }
 0x53f   :  { %v587_v0 = vmul.f32 %v584_v52, %v573_v60 }
 0x541   :  { %605 = vmatpush.msra.mxu3 %v587_v0 }
 0x543   :  { %606 = vmatpush.msra.mxu3 %v586_v2 }
 0x544   :  { %662 = vmatmul.msk.f32.vlgmr.msra.gmra.mxu3 %vm257_vm1, %v145_v1 }
 0x5c7   :  { %v608_v3 = vpop.f32.mrf.mxu3 }
 0x5c8   :  { %611 = vst.msk [vmem:[#allocation13] sm:$0xff] %vm158_vm0, %v608_v3 }
 0x5c9   :  { %622 = dma.vmem_to_hbm [thread:$0]  %s618_s16, 128, %s620_s18, [#allocation4]  }
 0x5ca   :  { %866 = dma.done.wait [#allocation4], 128  }
 0x5cb   :  { %867 = vsyncadd [#allocation4], 4294967168 }
 0x5cc   :  { %627 = vsyncpa [#allocation3], 1 }
 0x5cd   :  { %628 = vsyncpa [#allocation6], 1 }
 0x5ce   :  { %629 = vsyncpa [#allocation9], 1 }
 0x5cf   :  { %630 = vsyncpa [#allocation12], 1 }
 0x5d0   :  { %631 = vsyncpa [#allocation4], 1 }

</bundles_post_ra>
